<compile_context>
chip_gen: v5e
topology: v5e:2x2
jax: 0.10.0
libtpu: 0.0.40
codegen_flags: <defaults>
</compile_context>

<pallas_src>
import jax
import jax.numpy as jnp
from jax.experimental import pallas as pl
from jax.experimental.pallas import tpu as pltpu

HID = 32   # hidden width of affine1/affine2
OUT = 50   # number of classes (affine3 out)

# Packed-parameter slab layouts (see pack_params):
#   wmat: (82, 32)  rows 0:32  = w2^T (out,in), rows 32:82 = w3^T (out,in)
#   vecs: (50, 4)   col 0 = w1^T (32,1) zero-padded to 50 rows,
#                   col 1 = b1  (32,1) padded, col 2 = b2 (32,1) padded,
#                   col 3 = b3  (50,1)
WMAT_ROWS = HID + OUT


def _sigmoid(z):
    # One EUP transcendental per element (vs exp + reciprocal for logistic).
    return 0.5 * (jnp.tanh(0.5 * z) + 1.0)


def net_kernel(x_ref, wmat_ref, vecs_ref, o_ref):
    x = x_ref[...]                                  # (1, TB)   batch on lanes

    # Static slices of the resident weight slabs (cheap VMEM views/loads).
    w2t = wmat_ref[0:HID, :]                        # (32, 32)
    w3t = wmat_ref[HID:HID + OUT, :]                # (50, 32)
    w1c = vecs_ref[0:HID, 0:1]                      # (32, 1)
    b1c = vecs_ref[0:HID, 1:2]                      # (32, 1)
    b2c = vecs_ref[0:HID, 2:3]                      # (32, 1)
    b3c = vecs_ref[:, 3:4]                          # (50, 1)

    # Layer 1: contraction depth 1 -> pure VPU broadcast multiply (no MXU).
    h1 = _sigmoid(w1c * x + b1c)                                          # (32, TB)
    # Layers 2 and 3 on the MXU, f32 accumulation, batch stays on lanes.
    h2 = _sigmoid(jnp.dot(w2t, h1, preferred_element_type=jnp.float32) + b2c)
    h3 = _sigmoid(jnp.dot(w3t, h2, preferred_element_type=jnp.float32) + b3c)

    # Numerically-stable log-softmax along the class axis (sublane axis 0).
    m = jnp.max(h3, axis=0, keepdims=True)          # (1, TB)  XLU sublane reduce
    shifted = h3 - m
    e = jnp.exp(shifted)                            # EUP
    ones = jnp.ones((1, OUT), jnp.float32)
    denom = jnp.dot(ones, e, preferred_element_type=jnp.float32)  # (1, TB) MXU sum
    o_ref[...] = shifted - jnp.log(denom)           # (OUT, TB) lane-dense store


def pack_params(params):
    """Pre-transpose + pack (w1,b1,w2,b2,w3,b3) into two f32 slabs.

    Layout matches the transposed (feature-on-sublane, batch-on-lane) kernel.
    """
    w1, b1, w2, b2, w3, b3 = params          # w: (in, out), b: (1, out)
    wmat = jnp.concatenate([w2.T, w3.T], axis=0)            # (82, 32)
    pad = jnp.zeros((OUT - HID, 1), jnp.float32)
    vecs = jnp.concatenate(
        [
            jnp.concatenate([w1.T, pad], axis=0),            # (50, 1)
            jnp.concatenate([b1.T, pad], axis=0),            # (50, 1)
            jnp.concatenate([b2.T, pad], axis=0),            # (50, 1)
            b3.T,                                            # (50, 1)
        ],
        axis=1,
    )                                                        # (50, 4)
    return wmat, vecs


def _round_up(n, m):
    return ((n + m - 1) // m) * m


def net_forward(x, packed, *, tb_max=8192):
    """x: (B, 1) f32. packed: (wmat, vecs) from pack_params. Returns (B, 50) f32."""
    wmat, vecs = packed
    B = x.shape[0]
    x_t = x.reshape(1, B)                    # batch onto the lane axis

    # Batch tile: lane-aligned (multiple of 128), at least 2 grid steps when
    # B > 128 so the "parallel" axis can use both TCs on v7x, capped so the
    # double-buffered in/out tiles (~0.5 KiB/row incl. sublane padding) stay
    # far below the scoped-VMEM limits on every generation.
    TB = min(tb_max, _round_up(pl.cdiv(B, 2), 128))
    if TB >= B:
        TB = B                               # single full block (always legal)
    grid = (pl.cdiv(B, TB),)
    # Note: if B % TB != 0 the padded tail lanes compute on garbage but are
    # masked on writeback; lanes (rows of the original problem) are fully
    # independent — the class-axis reductions run over sublanes only — so
    # this is safe.  Keep that invariant if the kernel is ever extended.

    flops_per_row = 2 * (HID + HID * HID + HID * OUT + OUT)
    trans_per_row = HID + HID + OUT + OUT + 1      # 3 tanh layers + exp + log
    cost = pl.CostEstimate(
        flops=flops_per_row * B,
        transcendentals=trans_per_row * B,
        bytes_accessed=4 * (B + OUT * B + wmat.size + vecs.size),
    )

    out_t = pl.pallas_call(
        net_kernel,
        out_shape=jax.ShapeDtypeStruct((OUT, B), jnp.float32),
        grid=grid,
        in_specs=[
            pl.BlockSpec((1, TB), lambda i: (0, i)),              # batch-tiled input
            pl.BlockSpec((WMAT_ROWS, HID), lambda i: (0, 0)),     # resident weights
            pl.BlockSpec((OUT, 4), lambda i: (0, 0)),             # resident vectors
        ],
        out_specs=pl.BlockSpec((OUT, TB), lambda i: (0, i)),
        compiler_params=pltpu.CompilerParams(
            dimension_semantics=("parallel",)),                   # 2 TCs on v7x
        cost_estimate=cost,
    )(x_t, wmat, vecs)
    return out_t.T                          # (B, 50): layout plumbing outside kernel


def init_params(key):
    """Deterministic init mimicking PyTorch nn.Linear default:
    U(-1/sqrt(fan_in), 1/sqrt(fan_in)) for both weight and bias.
    Weights stored (in_features, out_features) so the reference is x @ W + b."""
    def linear(key, fan_in, fan_out):
        kw, kb = jax.random.split(key)
        bound = 1.0 / jnp.sqrt(fan_in)
        w = jax.random.uniform(kw, (fan_in, fan_out), jnp.float32, -bound, bound)
        b = jax.random.uniform(kb, (1, fan_out), jnp.float32, -bound, bound)
        return w, b

    k1, k2, k3 = jax.random.split(key, 3)
    w1, b1 = linear(k1, 1, HID)
    w2, b2 = linear(k2, HID, HID)
    w3, b3 = linear(k3, HID, OUT)
    return (w1, b1, w2, b2, w3, b3)


def reference_forward(x, params):
    """Pure-JAX reference for correctness check."""
    w1, b1, w2, b2, w3, b3 = params
    h = jax.nn.sigmoid(x @ w1 + b1)
    h = jax.nn.sigmoid(h @ w2 + b2)
    h = jax.nn.sigmoid(h @ w3 + b3)
    return jax.nn.log_softmax(h, axis=1)


if __name__ == "__main__":
    key = jax.random.PRNGKey(0)
    kx, kp, kx2, kx3 = jax.random.split(key, 4)

    params = init_params(kp)
    packed = pack_params(params)

    # Small-batch run (matches the module's natural tiny input: (B, 1)).
    B = 8
    x = jax.random.normal(kx, (B, 1), jnp.float32)
    out = jax.block_until_ready(net_forward(x, packed))
    ref = reference_forward(x, params)
    assert out.shape == (B, OUT)
    assert jnp.allclose(out, ref, atol=3e-5, rtol=1e-5)

    # Larger batch exercising the multi-step batch grid / pipelining path.
    B2 = 1024
    x2 = jax.random.normal(kx2, (B2, 1), jnp.float32)
    out2 = jax.block_until_ready(net_forward(x2, packed, tb_max=256))
    ref2 = reference_forward(x2, params)
    assert jnp.allclose(out2, ref2, atol=3e-5, rtol=1e-5)

    # Non-multiple batch exercising the masked partial tail block.
    B3 = 300
    x3 = jax.random.normal(kx3, (B3, 1), jnp.float32)
    out3 = jax.block_until_ready(net_forward(x3, packed))
    ref3 = reference_forward(x3, params)
    assert jnp.allclose(out3, ref3, atol=3e-5, rtol=1e-5)

    print("KERNEL_OK")
</pallas_src>

<mosaic_0001>
module attributes {stable_mosaic.version = 11 : i64} {
  func.func @net_kernel(%arg0: i32, %arg1: memref<1x8xf32, #tpu.memory_space<vmem>>, %arg2: memref<82x32xf32, #tpu.memory_space<vmem>>, %arg3: memref<50x4xf32, #tpu.memory_space<vmem>>, %arg4: memref<50x8xf32, #tpu.memory_space<vmem>>) attributes {dimension_semantics = [#tpu.dimension_semantics<parallel>], iteration_bounds = array<i64: 1>, scalar_prefetch = 0 : i64, scratch_operands = 0 : i64, tpu.core_type = #tpu.core_type<tc>, window_params = [{transform_indices = @transform_0, window_bounds = array<i64: 1, 8>}, {pipeline_mode = #tpu.pipeline_mode<synchronous>, transform_indices = @transform_1, window_bounds = array<i64: 82, 32>}, {pipeline_mode = #tpu.pipeline_mode<synchronous>, transform_indices = @transform_2, window_bounds = array<i64: 50, 4>}, {transform_indices = @transform_3, window_bounds = array<i64: 50, 8>}]} {
    %c0 = arith.constant 0 : index
    %c0_0 = arith.constant 0 : index
    %0 = vector.load %arg1[%c0, %c0_0] : memref<1x8xf32, #tpu.memory_space<vmem>>, vector<1x8xf32>
    %c0_1 = arith.constant 0 : index
    %c0_2 = arith.constant 0 : index
    %1 = vector.load %arg2[%c0_1, %c0_2] : memref<82x32xf32, #tpu.memory_space<vmem>>, vector<32x32xf32>
    %c32 = arith.constant 32 : index
    %c0_3 = arith.constant 0 : index
    %2 = vector.load %arg2[%c32, %c0_3] : memref<82x32xf32, #tpu.memory_space<vmem>>, vector<50x32xf32>
    %c0_4 = arith.constant 0 : index
    %c0_5 = arith.constant 0 : index
    %3 = vector.load %arg3[%c0_4, %c0_5] : memref<50x4xf32, #tpu.memory_space<vmem>>, vector<32x1xf32>
    %c0_6 = arith.constant 0 : index
    %c1 = arith.constant 1 : index
    %4 = vector.load %arg3[%c0_6, %c1] : memref<50x4xf32, #tpu.memory_space<vmem>>, vector<32x1xf32>
    %c0_7 = arith.constant 0 : index
    %c2 = arith.constant 2 : index
    %5 = vector.load %arg3[%c0_7, %c2] : memref<50x4xf32, #tpu.memory_space<vmem>>, vector<32x1xf32>
    %c0_8 = arith.constant 0 : index
    %c3 = arith.constant 3 : index
    %6 = vector.load %arg3[%c0_8, %c3] : memref<50x4xf32, #tpu.memory_space<vmem>>, vector<50x1xf32>
    %7 = vector.broadcast %3 : vector<32x1xf32> to vector<32x8xf32>
    %8 = vector.broadcast %0 : vector<1x8xf32> to vector<32x8xf32>
    %9 = arith.mulf %7, %8 : vector<32x8xf32>
    %10 = vector.broadcast %4 : vector<32x1xf32> to vector<32x8xf32>
    %11 = arith.addf %9, %10 : vector<32x8xf32>
    %cst = arith.constant 5.000000e-01 : f32
    %12 = vector.broadcast %cst : f32 to vector<32x8xf32>
    %13 = arith.mulf %12, %11 : vector<32x8xf32>
    %14 = math.tanh %13 : vector<32x8xf32>
    %cst_9 = arith.constant 1.000000e+00 : f32
    %15 = vector.broadcast %cst_9 : f32 to vector<32x8xf32>
    %16 = arith.addf %14, %15 : vector<32x8xf32>
    %cst_10 = arith.constant 5.000000e-01 : f32
    %17 = vector.broadcast %cst_10 : f32 to vector<32x8xf32>
    %18 = arith.mulf %17, %16 : vector<32x8xf32>
    %cst_11 = arith.constant dense<0.000000e+00> : vector<32x8xf32>
    %19 = tpu.matmul %1, %18, %cst_11 {dimension_numbers = #tpu.dot_dimension_numbers<[1], [0], [0], [1], [0, 0, 1, 1], [], []>} : vector<32x32xf32>, vector<32x8xf32>, vector<32x8xf32> -> vector<32x8xf32>
    %20 = vector.broadcast %5 : vector<32x1xf32> to vector<32x8xf32>
    %21 = arith.addf %19, %20 : vector<32x8xf32>
    %cst_12 = arith.constant 5.000000e-01 : f32
    %22 = vector.broadcast %cst_12 : f32 to vector<32x8xf32>
    %23 = arith.mulf %22, %21 : vector<32x8xf32>
    %24 = math.tanh %23 : vector<32x8xf32>
    %cst_13 = arith.constant 1.000000e+00 : f32
    %25 = vector.broadcast %cst_13 : f32 to vector<32x8xf32>
    %26 = arith.addf %24, %25 : vector<32x8xf32>
    %cst_14 = arith.constant 5.000000e-01 : f32
    %27 = vector.broadcast %cst_14 : f32 to vector<32x8xf32>
    %28 = arith.mulf %27, %26 : vector<32x8xf32>
    %cst_15 = arith.constant dense<0.000000e+00> : vector<50x8xf32>
    %29 = tpu.matmul %2, %28, %cst_15 {dimension_numbers = #tpu.dot_dimension_numbers<[1], [0], [0], [1], [0, 0, 1, 1], [], []>} : vector<50x32xf32>, vector<32x8xf32>, vector<50x8xf32> -> vector<50x8xf32>
    %30 = vector.broadcast %6 : vector<50x1xf32> to vector<50x8xf32>
    %31 = arith.addf %29, %30 : vector<50x8xf32>
    %cst_16 = arith.constant 5.000000e-01 : f32
    %32 = vector.broadcast %cst_16 : f32 to vector<50x8xf32>
    %33 = arith.mulf %32, %31 : vector<50x8xf32>
    %34 = math.tanh %33 : vector<50x8xf32>
    %cst_17 = arith.constant 1.000000e+00 : f32
    %35 = vector.broadcast %cst_17 : f32 to vector<50x8xf32>
    %36 = arith.addf %34, %35 : vector<50x8xf32>
    %cst_18 = arith.constant 5.000000e-01 : f32
    %37 = vector.broadcast %cst_18 : f32 to vector<50x8xf32>
    %38 = arith.mulf %37, %36 : vector<50x8xf32>
    %cst_19 = arith.constant dense<0xFF800000> : vector<8xf32>
    %39 = vector.multi_reduction <maximumf>, %38, %cst_19 [0] : vector<50x8xf32> to vector<8xf32>
    %40 = vector.shape_cast %39 : vector<8xf32> to vector<1x8xf32>
    %41 = vector.broadcast %40 : vector<1x8xf32> to vector<50x8xf32>
    %42 = arith.subf %38, %41 : vector<50x8xf32>
    %43 = math.exp %42 : vector<50x8xf32>
    %cst_20 = arith.constant 1.000000e+00 : f32
    %44 = vector.broadcast %cst_20 : f32 to vector<1x50xf32>
    %cst_21 = arith.constant dense<0.000000e+00> : vector<1x8xf32>
    %45 = tpu.matmul %44, %43, %cst_21 {dimension_numbers = #tpu.dot_dimension_numbers<[1], [0], [0], [1], [0, 0, 1, 1], [], []>} : vector<1x50xf32>, vector<50x8xf32>, vector<1x8xf32> -> vector<1x8xf32>
    %46 = math.log %45 : vector<1x8xf32>
    %47 = vector.broadcast %46 : vector<1x8xf32> to vector<50x8xf32>
    %48 = arith.subf %42, %47 : vector<50x8xf32>
    %c0_22 = arith.constant 0 : index
    %c0_23 = arith.constant 0 : index
    %49 = vector.load %arg4[%c0_22, %c0_23] : memref<50x8xf32, #tpu.memory_space<vmem>>, vector<50x8xf32>
    tpu.vector_store %arg4[%c0_22, %c0_23], %48 {strides = array<i32>} : memref<50x8xf32, #tpu.memory_space<vmem>>, vector<50x8xf32>,
    return
  }
  func.func @transform_0(%arg0: i32) -> (i32, i32) {
    %c0_i32 = arith.constant 0 : i32
    %c0_i32_0 = arith.constant 0 : i32
    return %c0_i32, %arg0 : i32, i32
  }
  func.func @transform_1(%arg0: i32) -> (i32, i32) {
    %c0_i32 = arith.constant 0 : i32
    %c0_i32_0 = arith.constant 0 : i32
    %c0_i32_1 = arith.constant 0 : i32
    return %c0_i32, %c0_i32_0 : i32, i32
  }
  func.func @transform_2(%arg0: i32) -> (i32, i32) {
    %c0_i32 = arith.constant 0 : i32
    %c0_i32_0 = arith.constant 0 : i32
    %c0_i32_1 = arith.constant 0 : i32
    return %c0_i32, %c0_i32_0 : i32, i32
  }
  func.func @transform_3(%arg0: i32) -> (i32, i32) {
    %c0_i32 = arith.constant 0 : i32
    %c0_i32_0 = arith.constant 0 : i32
    return %c0_i32, %arg0 : i32, i32
  }
}

</mosaic_0001>

<bundles_post_ra>
// kernel: tpu_custom_call.1
= control target key start
LH: loop header
LB: loop body
LE: loop exit
PB: predicated region body
PF: predicated region fallthrough
CT: control target
= control target key end

     0   :  { %v461_v0 = vmov 0   ;;  %v462_v1 = vmov 1   ;;  %v463_v20 = vmov 2   ;;  %vm112_vm0 = vcmask 261120   ;;  %s613_s2 = inlined_call_operand.vmem [shape: f32[50,4], index: 2, kind: input, shape index: {}]   ;;  %s614_s0 = inlined_call_operand.vmem [shape: f32[1,8], index: 0, kind: input, shape index: {}]   ;;  %s615_s1 = inlined_call_operand.vmem [shape: f32[82,32], index: 1, kind: input, shape index: {}]   ;;  %s616_s3 = inlined_call_operand.vmem [shape: f32[50,8], index: 3, kind: output, shape index: {}]  }
   0x1   :  { %401 = vset.pattern.permute.xlu0 %v461_v0  ;;  %402 = vset.pattern.permute.xlu1 %v462_v1  ;;  %v489_v2 = vld [vmem:[%s613_s2 + $0x18] sm:$0xff]  ;;  %v496_v3 = vld [vmem:[%s613_s2 + $0x10] sm:$0xff]  ;;  %v502_v4 = vld [vmem:[%s613_s2 + $0x8] sm:$0xff]  ;;  %v464_v47 = vmov 3   ;;  %vm288_vm1 = vcmask 64512   ;;  %vm297_vm2 = vcmask 58368  }
   0x2   :  { %50 = vperm.xlu0 %401, %v489_v2   ;;  %73 = vperm.xlu1 %402, %v489_v2   ;;  %v509_v5 = vld [vmem:[%s613_s2] sm:$0xff]  ;;  %v16_v41 = vld [vmem:[%s615_s1 + $0x8] sm:$0xff]  ;;  %v17_v42 = vld [vmem:[%s615_s1 + $0x10] sm:$0xff]  ;;  %vm334_vm3 = vcmask 1041408   ;;  %vm330_vm4 = vcmask 408576  }
   0x3   :  { %404 = vset.pattern.permute.xlu2 %v462_v1  ;;  %v414_v6 = vld [vmem:[%s614_s0] ss:$0 sm:$0xff]  ;;  %v18_v43 = vld [vmem:[%s615_s1 + $0x18] sm:$0xff]  ;;  %v32_v61 = vld [vmem:[%s613_s2 + $0x30] sm:$0x3] }
   0x4   :  { %69 = vperm.xlu2 %404, %v496_v3   ;;  %v15_v40 = vld [vmem:[%s615_s1] sm:$0xff] }
   0xa   :  { %45 = vperm.xlu0 %401, %v496_v3   ;;  %403 = vset.pattern.permute.xlu1 %v461_v0 }
   0xb   :  { %40 = vperm.xlu1 %403, %v502_v4  }
   0xc   :  { %405 = vset.pattern.permute.xlu2 %v461_v0 }
   0xd   :  { %35 = vperm.xlu2 %405, %v509_v5  }
  0x12   :  { %406 = vset.pattern.permute.xlu0 %v462_v1 }
  0x13   :  { %65 = vperm.xlu0 %406, %v502_v4   ;;  %407 = vset.pattern.permute.xlu1 %v462_v1 }
  0x14   :  { %61 = vperm.xlu1 %407, %v509_v5  }
  0x15   :  { %408 = vset.pattern.permute.xlu2 %v463_v20 }
  0x16   :  { %109 = vperm.xlu2 %408, %v489_v2  }
  0x1b   :  { %410 = vset.pattern.permute.xlu0 %v463_v20 }
  0x1c   :  { %409 = vset.pattern.permute.xlu1 %v463_v20  ;;  %97 = vperm.xlu0 %410, %v509_v5  }
  0x1d   :  { %105 = vperm.xlu1 %409, %v496_v3  }
  0x1e   :  { %101 = vperm.xlu2 %408, %v502_v4  }
  0x24   :  { %413 = vset.pattern.permute.xlu0 %v464_v47 }
  0x25   :  { %411 = vset.pattern.permute.xlu1 %v464_v47 }
  0x26   :  { %171 = vperm.xlu1 %411, %v509_v5   ;;  %412 = vset.pattern.permute.xlu2 %v464_v47 }
  0x27   :  { %175 = vperm.xlu2 %412, %v502_v4  }
  0x2e   :  { %179 = vperm.xlu1 %411, %v496_v3  }
  0x36   :  { %198 = vperm.xlu1 %411, %v32_v61  }
  0x5e   :  { %v70_v10 = vpop.permute.xlu2 %69 }
  0x67   :  { %v36_v17 = vpop.permute.xlu2 %35 }
  0x68   :  { %v56_v22 = vmul.f32 %v414_v6, %v36_v17  ;;  %v21_v17 = vld [vmem:[%s615_s1 + $0x30] sm:$0xff] }
  0x70   :  { %v110_v45 = vpop.permute.xlu2 %109 }
  0x74   :  { %v51_v7 = vpop.permute.xlu0 %50  ;;  %v74_v8 = vpop.permute.xlu1 %73 }
  0x75   :  { %v59_v9 = vmul.f32 %v414_v6, %v51_v7  ;;  %v31_v7 = vld [vmem:[%s613_s2 + $0x28] sm:$0xff] }
  0x76   :  { %193 = vperm.xlu0 %413, %v31_v7  }
  0x77   :  { %v79_v11 = vadd.f32 %v74_v8, %v59_v9  ;;  %v30_v8 = vld [vmem:[%s613_s2 + $0x20] sm:$0xff] }
  0x78   :  { %v102_v50 = vpop.permute.xlu2 %101  ;;  %188 = vperm.xlu2 %412, %v30_v8  }
  0x79   :  { %v83_v12 = vmul.f32 0.5, %v79_v11 }
  0x7b   :  { %415 = vtanh.f32 %v83_v12 }
  0x7c   :  { %v46_v13 = vpop.permute.xlu0 %45 }
  0x7d   :  { %v58_v14 = vmul.f32 %v414_v6, %v46_v13  ;;  %v41_v15 = vpop.permute.xlu1 %40  ;;  %v19_v13 = vld [vmem:[%s615_s1 + $0x20] sm:$0xff] }
  0x7e   :  { %v57_v23 = vmul.f32 %v414_v6, %v41_v15  ;;  %v20_v15 = vld [vmem:[%s615_s1 + $0x28] sm:$0xff] }
  0x7f   :  { %v78_v16 = vadd.f32 %v70_v10, %v58_v14  ;;  %v23_v14 = vld [vmem:[%s615_s1 + $0x40] sm:$0xff] }
  0x80   :  { %183 = vperm.xlu2 %412, %v489_v2   ;;  %v25_v2 = vld [vmem:[%s615_s1 + $0x50] sm:$0x3] }
  0x81   :  { %v416_v18 = vpop.eup %415  ;;  %v82_v19 = vmul.f32 0.5, %v78_v16  ;;  %v24_v16 = vld [vmem:[%s615_s1 + $0x48] sm:$0xff] }
  0x82   :  { %v91_v21 = vadd.f32 1.0, %v416_v18  ;;  %v22_v18 = vld [vmem:[%s615_s1 + $0x38] sm:$0xff] }
  0x83   :  { %417 = vtanh.f32 %v82_v19  ;;  %v176_v19 = vpop.permute.xlu2 %175 }
  0x84   :  { %v95_v24 = vmul.f32 0.5, %v91_v21 }
  0x85   :  { %v66_v25 = vpop.permute.xlu0 %65 }
  0x86   :  { %v77_v26 = vadd.f32 %v66_v25, %v57_v23  ;;  %137 = vmatpush.msra.mxu0 %v95_v24  ;;  %v62_v27 = vpop.permute.xlu1 %61 }
  0x87   :  { %v76_v28 = vadd.f32 %v62_v27, %v56_v22 }
  0x88   :  { %v81_v29 = vmul.f32 0.5, %v77_v26 }
  0x89   :  { %v418_v30 = vpop.eup %417  ;;  %v80_v31 = vmul.f32 0.5, %v76_v28 }
  0x8a   :  { %419 = vtanh.f32 %v81_v29  ;;  %v90_v32 = vadd.f32 1.0, %v418_v30 }
  0x8b   :  { %421 = vtanh.f32 %v80_v31 }
  0x8c   :  { %v94_v33 = vmul.f32 0.5, %v90_v32 }
  0x8e   :  { %138 = vmatpush.msra.mxu0 %v94_v33  ;;  %v98_v52 = vpop.permute.xlu0 %97 }
  0x8f   :  { %v106_v48 = vpop.permute.xlu1 %105 }
  0x90   :  { %v420_v34 = vpop.eup %419 }
  0x91   :  { %v422_v35 = vpop.eup %421  ;;  %v89_v36 = vadd.f32 1.0, %v420_v34 }
  0x92   :  { %v88_v37 = vadd.f32 1.0, %v422_v35 }
  0x93   :  { %v93_v38 = vmul.f32 0.5, %v89_v36 }
  0x94   :  { %v92_v39 = vmul.f32 0.5, %v88_v37 }
  0x95   :  { %139 = vmatpush.msra.mxu0 %v93_v38 }
  0x97   :  { %140 = vmatpush.msra.mxu0 %v92_v39 }
  0x98   :  { %379 = vmatmul.msk.f32.vlgmr.msra.gmra.mxu0 %vm112_vm0, %v15_v40  ;;  %v172_v21 = vpop.permute.xlu1 %171 }
  0xa0   :  { %380 = vmatmul.msk.f32.gmra.mxu0 %vm112_vm0, %v16_v41  ;;  %v180_v27 = vpop.permute.xlu1 %179 }
  0xa8   :  { %381 = vmatmul.msk.f32.gmra.mxu0 %vm112_vm0, %v17_v42  ;;  %v199_v39 = vpop.permute.xlu1 %198 }
  0xb0   :  { %382 = vmatmul.msk.f32.gmra.mxu0 %vm112_vm0, %v18_v43 }
  0xd2   :  { %v189_v23 = vpop.permute.xlu2 %188 }
  0xe8   :  { %v194_v29 = vpop.permute.xlu0 %193 }
 0x115   :  { %v142_v44 = vpop.f32.mrf.mxu0 }
 0x116   :  { %v143_v54 = vadd.f32 %v142_v44, %v98_v52  ;;  %v184_v44 = vpop.permute.xlu2 %183 }
 0x118   :  { %v154_v59 = vmul.f32 0.5, %v143_v54 }
 0x11d   :  { %v145_v46 = vpop.f32.mrf.mxu0 }
 0x11e   :  { %v146_v53 = vadd.f32 %v145_v46, %v102_v50 }
 0x120   :  { %v155_v56 = vmul.f32 0.5, %v146_v53 }
 0x125   :  { %v148_v49 = vpop.f32.mrf.mxu0 }
 0x126   :  { %v149_v51 = vadd.f32 %v148_v49, %v106_v48 }
 0x128   :  { %v156_v55 = vmul.f32 0.5, %v149_v51 }
 0x12a   :  { %423 = vtanh.f32 %v156_v55 }
 0x12b   :  { %425 = vtanh.f32 %v155_v56 }
 0x12d   :  { %v151_v57 = vpop.f32.mrf.mxu0 }
 0x12e   :  { %v152_v58 = vadd.f32 %v151_v57, %v110_v45 }
 0x130   :  { %v157_v60 = vmul.f32 0.5, %v152_v58  ;;  %v424_v62 = vpop.eup %423 }
 0x131   :  { %v426_v63 = vpop.eup %425  ;;  %v164_v4 = vadd.f32 1.0, %v424_v62 }
 0x132   :  { %427 = vtanh.f32 %v157_v60  ;;  %v163_v3 = vadd.f32 1.0, %v426_v63 }
 0x133   :  { %429 = vtanh.f32 %v154_v59  ;;  %v168_v9 = vmul.f32 0.5, %v164_v4 }
 0x134   :  { %v167_v11 = vmul.f32 0.5, %v163_v3 }
 0x138   :  { %v428_v0 = vpop.eup %427 }
 0x139   :  { %v165_v1 = vadd.f32 1.0, %v428_v0  ;;  %v430_v5 = vpop.eup %429 }
 0x13a   :  { %v162_v10 = vadd.f32 1.0, %v430_v5 }
 0x13b   :  { %v169_v6 = vmul.f32 0.5, %v165_v1 }
 0x13c   :  { %v166_v12 = vmul.f32 0.5, %v162_v10 }
 0x13d   :  { %234 = vmatpush.msra.mxu1 %v169_v6  ;;  %392 = vmatpush.msra.mxu3 %v169_v6 }
 0x13f   :  { %235 = vmatpush.msra.mxu1 %v168_v9  ;;  %393 = vmatpush.msra.mxu3 %v168_v9 }
 0x141   :  { %236 = vmatpush.msra.mxu1 %v167_v11  ;;  %394 = vmatpush.msra.mxu3 %v167_v11 }
 0x143   :  { %237 = vmatpush.msra.mxu1 %v166_v12  ;;  %395 = vmatpush.msra.mxu3 %v166_v12 }
 0x144   :  { %383 = vmatmul.msk.f32.vlgmr.msra.gmra.mxu1 %vm112_vm0, %v19_v13  ;;  %387 = vmatmul.msk.f32.vlgmr.msra.gmra.mxu3 %vm112_vm0, %v23_v14 }
 0x14c   :  { %384 = vmatmul.msk.f32.gmra.mxu1 %vm112_vm0, %v20_v15  ;;  %388 = vmatmul.msk.f32.gmra.mxu3 %vm112_vm0, %v24_v16 }
 0x154   :  { %385 = vmatmul.msk.f32.gmra.mxu1 %vm112_vm0, %v21_v17  ;;  %389 = vmatmul.msk.f32.gmra.mxu3 %vm112_vm0, %v25_v2 }
 0x15c   :  { %386 = vmatmul.msk.f32.gmra.mxu1 %vm112_vm0, %v22_v18 }
 0x1c1   :  { %v239_v20 = vpop.f32.mrf.mxu1 }
 0x1c2   :  { %v240_v28 = vadd.f32 %v239_v20, %v172_v21 }
 0x1c4   :  { %v260_v34 = vmul.f32 0.5, %v240_v28 }
 0x1c7   :  { %v251_v22 = vpop.f32.mrf.mxu3 }
 0x1c8   :  { %v252_v25 = vadd.f32 %v251_v22, %v189_v23 }
 0x1c9   :  { %v242_v24 = vpop.f32.mrf.mxu1 }
 0x1ca   :  { %v243_v26 = vadd.f32 %v242_v24, %v176_v19  ;;  %v264_v30 = vmul.f32 0.5, %v252_v25 }
 0x1cc   :  { %v261_v31 = vmul.f32 0.5, %v243_v26  ;;  %431 = vtanh.f32 %v264_v30 }
 0x1ce   :  { %433 = vtanh.f32 %v261_v31 }
 0x1cf   :  { %v254_v32 = vpop.f32.mrf.mxu3 }
 0x1d0   :  { %v255_v33 = vadd.f32 %v254_v32, %v194_v29 }
 0x1d1   :  { %v245_v35 = vpop.f32.mrf.mxu1 }
 0x1d2   :  { %v265_v36 = vmul.f32 0.5, %v255_v33  ;;  %v246_v37 = vadd.f32 %v245_v35, %v180_v27  ;;  %v432_v41 = vpop.eup %431 }
 0x1d3   :  { %v278_v53 = vadd.f32 1.0, %v432_v41 }
 0x1d4   :  { %435 = vtanh.f32 %v265_v36  ;;  %v262_v38 = vmul.f32 0.5, %v246_v37  ;;  %v434_v43 = vpop.eup %433 }
 0x1d5   :  { %437 = vtanh.f32 %v260_v34  ;;  %v275_v54 = vadd.f32 1.0, %v434_v43  ;;  %v285_v58 = vmul.f32 0.5, %v278_v53 }
 0x1d6   :  { %439 = vtanh.f32 %v262_v38 }
 0x1d7   :  { %v257_v40 = vpop.f32.mrf.mxu3  ;;  %v282_v59 = vmul.f32 0.5, %v275_v54  ;;  %v293_v4 = vsel %vm288_vm1, %v285_v58, -inf }
 0x1d8   :  { %v258_v42 = vadd.f32 %v257_v40, %v199_v39 }
 0x1d9   :  { %v248_v45 = vpop.f32.mrf.mxu1  ;;  %v290_v5 = vsel %vm288_vm1, %v282_v59, -inf }
 0x1da   :  { %v436_v46 = vpop.eup %435  ;;  %v266_v47 = vmul.f32 0.5, %v258_v42  ;;  %v249_v48 = vadd.f32 %v248_v45, %v184_v44  ;;  %v465_v44 = vmov 1.0  }
 0x1db   :  { %v438_v49 = vpop.eup %437  ;;  %v279_v50 = vadd.f32 1.0, %v436_v46 }
 0x1dc   :  { %v440_v51 = vpop.eup %439  ;;  %441 = vtanh.f32 %v266_v47  ;;  %v263_v52 = vmul.f32 0.5, %v249_v48  ;;  %v274_v55 = vadd.f32 1.0, %v438_v49 }
 0x1dd   :  { %v286_v56 = vmul.f32 0.5, %v279_v50  ;;  %v276_v57 = vadd.f32 1.0, %v440_v51 }
 0x1de   :  { %443 = vtanh.f32 %v263_v52  ;;  %v281_v61 = vmul.f32 0.5, %v274_v55 }
 0x1df   :  { %v295_v62 = vsel %vm288_vm1, %v286_v56, -inf  ;;  %v283_v63 = vmul.f32 0.5, %v276_v57 }
 0x1e0   :  { %v296_v7 = vmax.f32 %v290_v5, %v295_v62  ;;  %v289_v8 = vsel %vm288_vm1, %v281_v61, -inf }
 0x1e1   :  { %v291_v9 = vsel %vm288_vm1, %v283_v63, -inf  ;;  %v294_v12 = vmax.f32 %v289_v8, %v293_v4 }
 0x1e2   :  { %v442_v60 = vpop.eup %441 }
 0x1e3   :  { %v280_v0 = vadd.f32 1.0, %v442_v60  ;;  %v300_v15 = vmax.f32 %v294_v12, %v296_v7 }
 0x1e4   :  { %v444_v1 = vpop.eup %443 }
 0x1e5   :  { %v287_v6 = vmul.f32 0.5, %v280_v0  ;;  %v277_v3 = vadd.f32 1.0, %v444_v1 }
 0x1e7   :  { %v298_v10 = vsel %vm297_vm2, %v287_v6, -inf  ;;  %v284_v11 = vmul.f32 0.5, %v277_v3 }
 0x1e8   :  { %v299_v13 = vmax.f32 %v291_v9, %v298_v10 }
 0x1e9   :  { %v292_v14 = vsel %vm288_vm1, %v284_v11, -inf }
 0x1ea   :  { %v301_v16 = vmax.f32 %v299_v13, %v292_v14 }
 0x1ec   :  { %v302_v17 = vmax.f32 %v300_v15, %v301_v16 }
 0x1ee   :  { %v303_v2 = vrot.slane %v302_v17, 4 }
 0x1f0   :  { %v304_v18 = vmax.f32 %v302_v17, %v303_v2 }
 0x1f2   :  { %v305_v19 = vrot.slane %v304_v18, 2 }
 0x1f4   :  { %v306_v20 = vmax.f32 %v304_v18, %v305_v19 }
 0x1f6   :  { %v307_v21 = vrot.slane %v306_v20, 1 }
 0x1f8   :  { %v308_v22 = vmax.f32 %v306_v20, %v307_v21 }
 0x1fa   :  { %v315_v23 = vsub.f32 %v287_v6, %v308_v22  ;;  %v314_v24 = vsub.f32 %v286_v56, %v308_v22  ;;  %v313_v25 = vsub.f32 %v285_v58, %v308_v22  ;;  %v312_v26 = vsub.f32 %v284_v11, %v308_v22 }
 0x1fb   :  { %v311_v30 = vsub.f32 %v283_v63, %v308_v22  ;;  %v310_v32 = vsub.f32 %v282_v59, %v308_v22  ;;  %v309_v34 = vsub.f32 %v281_v61, %v308_v22 }
 0x1fc   :  { %v328_v27 = vmul.f32 1.442695, %v315_v23  ;;  %v326_v28 = vmul.f32 1.442695, %v314_v24  ;;  %v324_v29 = vmul.f32 1.442695, %v313_v25 }
 0x1fd   :  { %v322_v31 = vmul.f32 1.442695, %v312_v26  ;;  %v320_v33 = vmul.f32 1.442695, %v311_v30  ;;  %v318_v36 = vmul.f32 1.442695, %v310_v32 }
 0x1fe   :  { %445 = vpow2.f32 %v328_v27  ;;  %v316_v38 = vmul.f32 1.442695, %v309_v34 }
 0x1ff   :  { %447 = vpow2.f32 %v326_v28 }
 0x200   :  { %449 = vpow2.f32 %v324_v29 }
 0x201   :  { %451 = vpow2.f32 %v322_v31 }
 0x202   :  { %453 = vpow2.f32 %v320_v33 }
 0x203   :  { %455 = vpow2.f32 %v318_v36 }
 0x204   :  { %v446_v35 = vpop.eup %445  ;;  %457 = vpow2.f32 %v316_v38 }
 0x205   :  { %390 = vmatpush.msk.msra.mxu2 %vm334_vm3, %v446_v35  ;;  %v448_v37 = vpop.eup %447 }
 0x206   :  { %v450_v39 = vpop.eup %449 }
 0x207   :  { %348 = vmatpush.msra.mxu2 %v448_v37  ;;  %v452_v40 = vpop.eup %451 }
 0x208   :  { %v454_v41 = vpop.eup %453 }
 0x209   :  { %349 = vmatpush.msra.mxu2 %v450_v39  ;;  %v456_v42 = vpop.eup %455 }
 0x20a   :  { %v458_v43 = vpop.eup %457 }
 0x20b   :  { %350 = vmatpush.msra.mxu2 %v452_v40 }
 0x20d   :  { %351 = vmatpush.msra.mxu2 %v454_v41 }
 0x20f   :  { %352 = vmatpush.msra.mxu2 %v456_v42 }
 0x211   :  { %353 = vmatpush.msra.mxu2 %v458_v43 }
 0x212   :  { %391 = vmatmul.msk.f32.vlgmr.msra.gmra.mxu2 %vm330_vm4, %v465_v44 }
 0x295   :  { %v355_v45 = vpop.f32.mrf.mxu2 }
 0x296   :  { %459 = vlog2.f32 %v355_v45 }
 0x29c   :  { %v460_v46 = vpop.eup %459 }
 0x29d   :  { %v359_v47 = vmul.f32 0.6931472, %v460_v46 }
 0x29f   :  { %v360_v48 = vperm.slane %v359_v47, 0 }
 0x2a1   :  { %v361_v49 = vsub.f32 %v309_v34, %v360_v48  ;;  %v362_v50 = vsub.f32 %v310_v32, %v360_v48  ;;  %v363_v51 = vsub.f32 %v311_v30, %v360_v48  ;;  %v364_v52 = vsub.f32 %v312_v26, %v360_v48 }
 0x2a2   :  { %v365_v53 = vsub.f32 %v313_v25, %v360_v48  ;;  %v366_v54 = vsub.f32 %v314_v24, %v360_v48  ;;  %v367_v55 = vsub.f32 %v315_v23, %v360_v48 }
 0x2a3   :  { %368 = vst.msk [vmem:[%s616_s3] sm:$0xff] %vm288_vm1, %v361_v49 }
 0x2a4   :  { %369 = vst.msk [vmem:[%s616_s3 + $0x8] sm:$0xff] %vm288_vm1, %v362_v50 }
 0x2a5   :  { %370 = vst.msk [vmem:[%s616_s3 + $0x10] sm:$0xff] %vm288_vm1, %v363_v51 }
 0x2a6   :  { %371 = vst.msk [vmem:[%s616_s3 + $0x18] sm:$0xff] %vm288_vm1, %v364_v52 }
 0x2a7   :  { %372 = vst.msk [vmem:[%s616_s3 + $0x20] sm:$0xff] %vm288_vm1, %v365_v53 }
 0x2a8   :  { %373 = vst.msk [vmem:[%s616_s3 + $0x28] sm:$0xff] %vm288_vm1, %v366_v54 }
 0x2a9   :  { %374 = vst.msk [vmem:[%s616_s3 + $0x30] sm:$0x3] %vm297_vm2, %v367_v55 }

</bundles_post_ra>
